<compile_context>
chip_gen: v6e
topology: v6e:2x2x1
jax: 0.10.0
libtpu: 0.0.40
codegen_flags: <defaults>
</compile_context>

<pallas_src>
import jax
import jax.numpy as jnp
from jax.experimental import pallas as pl
from jax.experimental.pallas import tpu as pltpu


def _round_up(x, m):
    return pl.cdiv(x, m) * m


# ---------------------------------------------------------------------------
# Kernels: grid = (row_tiles, hidden_tiles)
# ---------------------------------------------------------------------------
def _propagator_kernel(x_ref, w0_ref, b0_ref, w1_ref, b1_ref, o_ref, acc_ref):
    k = pl.program_id(1)

    @pl.when(k == 0)
    def _init():
        acc_ref[...] = jnp.broadcast_to(b1_ref[...], acc_ref.shape)

    x = x_ref[...].astype(w0_ref.dtype)                  # cast-on-read (VPU filler)
    h = jnp.dot(x, w0_ref[...], preferred_element_type=jnp.float32)
    h = jnp.maximum(h + b0_ref[...], 0.0)                # ReLU(hidden block)
    acc_ref[...] += jnp.dot(h.astype(w1_ref.dtype), w1_ref[...],
                            preferred_element_type=jnp.float32)

    @pl.when(k == pl.num_programs(1) - 1)
    def _finalize():
        o_ref[...] = jnp.maximum(acc_ref[...], 0.0).astype(o_ref.dtype)


def _propagator_res_kernel(x_ref, res_ref, w0_ref, b0_ref, w1_ref, b1_ref,
                           o_ref, acc_ref):
    k = pl.program_id(1)

    @pl.when(k == 0)
    def _init():
        acc_ref[...] = jnp.broadcast_to(b1_ref[...], acc_ref.shape)

    x = x_ref[...].astype(w0_ref.dtype)
    h = jnp.dot(x, w0_ref[...], preferred_element_type=jnp.float32)
    h = jnp.maximum(h + b0_ref[...], 0.0)
    acc_ref[...] += jnp.dot(h.astype(w1_ref.dtype), w1_ref[...],
                            preferred_element_type=jnp.float32)

    @pl.when(k == pl.num_programs(1) - 1)
    def _finalize():
        y = acc_ref[...] + res_ref[...].astype(jnp.float32)   # residual, then ReLU
        o_ref[...] = jnp.maximum(y, 0.0).astype(o_ref.dtype)


# ---------------------------------------------------------------------------
# Wrapper
# ---------------------------------------------------------------------------
def _default_vmem_budget_bytes():
    """~75% of per-core physical VMEM (≈48 MiB on v7x, ≈96 MiB on v5e/v6e)."""
    cap = 64 << 20                                   # v7x-safe lower bound
    try:
        cap = int(pltpu.get_tpu_info().vmem_capacity_bytes)
    except Exception:
        pass
    return (cap * 3) // 4


def propagator_forward(x, w0, b0, w1, b1, res=None, *,
                       tm=None, bh=None,
                       compute_dtype=jnp.bfloat16,
                       out_dtype=None,
                       vmem_budget_bytes=None):
    """Pallas implementation of Propagator.forward.

    x   : (..., input_size)
    w0  : (input_size, hidden_size)   b0 : (hidden_size,)
    w1  : (hidden_size, output_size)  b1 : (output_size,)
    res : optional (..., output_size)
    returns (..., output_size) in out_dtype (default: x.dtype).
    """
    s_x = x.shape
    in_f = s_x[-1]
    hid = w0.shape[1]
    out_f = w1.shape[1]
    compute_dtype = jnp.dtype(compute_dtype)
    out_dtype = jnp.dtype(out_dtype if out_dtype is not None else x.dtype)
    c_sz = compute_dtype.itemsize
    o_sz = out_dtype.itemsize

    x2 = x.reshape(-1, in_f)
    n_rows = x2.shape[0]

    # Lane-dense feature padding (multiples of 128); zero padding is exact.
    in_p = _round_up(in_f, 128)
    out_p = _round_up(out_f, 128)
    hid_p128 = _round_up(hid, 128)

    if vmem_budget_bytes is None:
        vmem_budget_bytes = _default_vmem_budget_bytes()
    vmem_limit = int(min(vmem_budget_bytes, 128 << 20))

    # bf16 vregs pack 16 sublanes; align row tiles accordingly.
    row_align = 16 if min(c_sz, o_sz, jnp.dtype(x.dtype).itemsize) < 4 else 8

    # Conservative per-stream byte sizes for the fit check.
    x_bytes = max(jnp.dtype(x.dtype).itemsize, c_sz)
    res_bytes = max(jnp.dtype(res.dtype).itemsize, c_sz) if res is not None else 0

    def _vmem_bytes(tm_, th_):
        """Peak-VMEM estimate: pipeline buffers + scratch + f32 intermediates."""
        hid_p_ = _round_up(hid, th_)
        n_k_ = hid_p_ // th_
        wbuf = 1 if n_k_ == 1 else 2      # constant-index operands single-buffered
        byt = 2 * tm_ * in_p * x_bytes                      # x tile (double-buffered)
        byt += 2 * tm_ * out_p * o_sz                       # out tile (double-buffered)
        if res is not None:
            byt += 2 * tm_ * out_p * res_bytes              # residual tile
        byt += wbuf * (in_p * th_ + th_ * out_p) * c_sz     # weights
        byt += wbuf * th_ * 4 + out_p * 4                   # biases (f32)
        byt += tm_ * out_p * 4                              # f32 accumulator scratch
        byt += tm_ * th_ * (4 + c_sz)                       # f32 h + its compute cast
        byt += tm_ * out_p * 4                              # partial dot before +=
        return byt

    # ---- hidden block size ---------------------------------------------------
    if bh is not None:
        th = min(_round_up(bh, 128), hid_p128)
    else:
        th = hid_p128                                        # no hidden tiling

    # ---- row tile: large, balanced across the real grid ----------------------
    if tm is None:
        tm_target = 1024 if vmem_budget_bytes >= (80 << 20) else 512
    else:
        tm_target = max(int(tm), row_align)
    n_row_tiles = pl.cdiv(n_rows, tm_target)
    tm_eff = _round_up(pl.cdiv(n_rows, n_row_tiles), row_align)

    # ---- auto-shrink to the VMEM budget: rows first, then hidden tiling ------
    while _vmem_bytes(tm_eff, th) > vmem_budget_bytes:
        if tm_eff > 128:
            tm_eff = max(128, _round_up(tm_eff // 2, row_align))
        elif bh is None and th > 128:
            th = max(128, _round_up(th // 2, 128))
        elif tm_eff > row_align:
            tm_eff = max(row_align, _round_up(tm_eff // 2, row_align))
        else:
            break   # smallest legal tiles; let the compiler take it from here

    # Re-balance so an awkward n_rows doesn't pad up to ~2x wasted work.
    n_row_tiles = pl.cdiv(n_rows, tm_eff)
    tm_eff = _round_up(pl.cdiv(n_rows, n_row_tiles), row_align)
    n_rows_p = n_row_tiles * tm_eff

    hid_p = _round_up(hid, th)
    n_k = hid_p // th
    grid = (n_row_tiles, n_k)
    row_pad = n_rows_p - n_rows

    # ---- wrapper-side padding / casting (layout plumbing only) ---------------
    if row_pad == 0 and in_p == in_f:
        xp = x2                                  # pass through; kernel casts on VPU
    else:
        xp = jnp.pad(x2, ((0, row_pad), (0, in_p - in_f))).astype(compute_dtype)

    w0p = jnp.pad(w0, ((0, in_p - in_f), (0, hid_p - hid))).astype(compute_dtype)
    w1p = jnp.pad(w1, ((0, hid_p - hid), (0, out_p - out_f))).astype(compute_dtype)
    b0p = jnp.pad(b0, (0, hid_p - hid)).reshape(1, hid_p).astype(jnp.float32)
    b1p = jnp.pad(b1, (0, out_p - out_f)).reshape(1, out_p).astype(jnp.float32)

    if res is not None:
        res2 = res.reshape(-1, res.shape[-1])
        if row_pad == 0 and out_p == out_f:
            resp = res2                          # pass through; kernel casts to f32
        else:
            resp = jnp.pad(res2, ((0, row_pad),
                                  (0, out_p - out_f))).astype(compute_dtype)

    def _call(single_buffer):
        def spec(shape, index_map, constant=False):
            if constant and single_buffer:
                # Constant block index -> one resident buffer is enough.
                return pl.BlockSpec(shape, index_map, pipeline_mode=pl.Buffered(1))
            return pl.BlockSpec(shape, index_map)

        x_spec = pl.BlockSpec((tm_eff, in_p), lambda i, k: (i, 0))
        o_spec = pl.BlockSpec((tm_eff, out_p), lambda i, k: (i, 0))
        w0_spec = spec((in_p, th), lambda i, k: (0, k), constant=(n_k == 1))
        b0_spec = spec((1, th), lambda i, k: (0, k), constant=(n_k == 1))
        w1_spec = spec((th, out_p), lambda i, k: (k, 0), constant=(n_k == 1))
        b1_spec = spec((1, out_p), lambda i, k: (0, 0), constant=True)

        compiler_params = pltpu.CompilerParams(
            dimension_semantics=("parallel", "arbitrary"),
            vmem_limit_bytes=vmem_limit)
        out_shape = jax.ShapeDtypeStruct((n_rows_p, out_p), out_dtype)
        scratch = [pltpu.VMEM((tm_eff, out_p), jnp.float32)]

        if res is None:
            return pl.pallas_call(
                _propagator_kernel,
                out_shape=out_shape,
                grid_spec=pltpu.PrefetchScalarGridSpec(
                    num_scalar_prefetch=0, grid=grid,
                    in_specs=[x_spec, w0_spec, b0_spec, w1_spec, b1_spec],
                    out_specs=o_spec,
                    scratch_shapes=scratch),
                compiler_params=compiler_params,
            )(xp, w0p, b0p, w1p, b1p)

        res_spec = pl.BlockSpec((tm_eff, out_p), lambda i, k: (i, 0))
        return pl.pallas_call(
            _propagator_res_kernel,
            out_shape=out_shape,
            grid_spec=pltpu.PrefetchScalarGridSpec(
                num_scalar_prefetch=0, grid=grid,
                in_specs=[x_spec, res_spec, w0_spec, b0_spec, w1_spec, b1_spec],
                out_specs=o_spec,
                scratch_shapes=scratch),
            compiler_params=compiler_params,
        )(xp, resp, w0p, b0p, w1p, b1p)

    try:
        out = _call(single_buffer=True)
    except Exception:
        # pipeline_mode=pl.Buffered(1) unsupported on this JAX build: fall back to
        # default double-buffering (correctness unaffected, only VMEM footprint).
        out = _call(single_buffer=False)

    out = out[:n_rows, :out_f]
    return out.reshape(tuple(s_x[:-1]) + (out_f,))


# ---------------------------------------------------------------------------
# Pure-JAX reference (matches the PyTorch module)
# ---------------------------------------------------------------------------
def propagator_reference(x, w0, b0, w1, b1, res=None):
    s_x = x.shape
    h = jnp.maximum(x.reshape(-1, s_x[-1]) @ w0 + b0, 0.0)
    y = h @ w1 + b1
    if res is not None:
        y = y + res.reshape(-1, res.shape[-1])
    y = jnp.maximum(y, 0.0)
    return y.reshape(tuple(s_x[:-1]) + (w1.shape[1],))


if __name__ == "__main__":
    key = jax.random.PRNGKey(0)
    batch, seq = 2, 8
    input_size, hidden_size, output_size = 32, 64, 32

    k_x, k_res, k_w0, k_b0, k_w1, k_b1 = jax.random.split(key, 6)
    x = jax.random.normal(k_x, (batch, seq, input_size), dtype=jnp.float32)
    res = jax.random.normal(k_res, (batch, seq, output_size), dtype=jnp.float32)

    # nn.Linear(in, out) weights stored transposed as (in, out).
    w0 = jax.random.normal(k_w0, (input_size, hidden_size), dtype=jnp.float32) * 0.1
    b0 = jax.random.normal(k_b0, (hidden_size,), dtype=jnp.float32) * 0.1
    w1 = jax.random.normal(k_w1, (hidden_size, output_size), dtype=jnp.float32) * 0.1
    b1 = jax.random.normal(k_b1, (output_size,), dtype=jnp.float32) * 0.1

    ref = propagator_reference(x, w0, b0, w1, b1, res=res)
    ref_nores = propagator_reference(x, w0, b0, w1, b1, res=None)

    # f32 compute path: exact to tight tolerance, with and without residual.
    out = jax.block_until_ready(
        propagator_forward(x, w0, b0, w1, b1, res=res, compute_dtype=jnp.float32))
    assert out.shape == (batch, seq, output_size)
    assert jnp.allclose(out, ref, atol=1e-5, rtol=1e-5)

    out2 = jax.block_until_ready(
        propagator_forward(x, w0, b0, w1, b1, res=None, compute_dtype=jnp.float32))
    assert jnp.allclose(out2, ref_nores, atol=1e-5, rtol=1e-5)

    # Default bf16-compute path (MXU-friendly), looser tolerance vs f32 reference.
    out_bf = jax.block_until_ready(propagator_forward(x, w0, b0, w1, b1, res=res))
    assert jnp.allclose(out_bf.astype(jnp.float32), ref, atol=5e-2, rtol=5e-2)

    # Awkward row count + forced hidden-dim tiling (multi-step 2-D grid + residual).
    hid2 = 256
    kw = jax.random.split(k_w0, 4)
    w0b = jax.random.normal(kw[0], (input_size, hid2), dtype=jnp.float32) * 0.1
    b0b = jax.random.normal(kw[1], (hid2,), dtype=jnp.float32) * 0.1
    w1b = jax.random.normal(kw[2], (hid2, output_size), dtype=jnp.float32) * 0.1
    b1b = jax.random.normal(kw[3], (output_size,), dtype=jnp.float32) * 0.1
    x_big = jax.random.normal(k_res, (3, 37, input_size), dtype=jnp.float32)
    res_big = jax.random.normal(k_b1, (3, 37, output_size), dtype=jnp.float32)
    out_big = jax.block_until_ready(
        propagator_forward(x_big, w0b, b0b, w1b, b1b, res=res_big,
                           compute_dtype=jnp.float32, tm=16, bh=128))
    ref_big = propagator_reference(x_big, w0b, b0b, w1b, b1b, res=res_big)
    assert out_big.shape == (3, 37, output_size)
    assert jnp.allclose(out_big, ref_big, atol=1e-5, rtol=1e-5)

    # Lane/row-exact shapes exercise the no-pad pass-through (in-kernel cast) path.
    x_al = jax.random.normal(k_x, (4, 64, 128), dtype=jnp.float32)
    w0a = jax.random.normal(kw[0], (128, 128), dtype=jnp.float32) * 0.1
    b0a = jax.random.normal(kw[1], (128,), dtype=jnp.float32) * 0.1
    w1a = jax.random.normal(kw[2], (128, 128), dtype=jnp.float32) * 0.1
    b1a = jax.random.normal(kw[3], (128,), dtype=jnp.float32) * 0.1
    out_al = jax.block_until_ready(
        propagator_forward(x_al, w0a, b0a, w1a, b1a,
                           compute_dtype=jnp.float32, tm=128))
    ref_al = propagator_reference(x_al, w0a, b0a, w1a, b1a)
    assert jnp.allclose(out_al, ref_al, atol=1e-5, rtol=1e-5)

    print("KERNEL_OK")
</pallas_src>

<mosaic_0001>
module attributes {stable_mosaic.version = 11 : i64} {
  func.func @_propagator_res_kernel(%arg0: i32, %arg1: i32, %arg2: memref<16x128xf32, #tpu.memory_space<vmem>>, %arg3: memref<16x128xf32, #tpu.memory_space<vmem>>, %arg4: memref<128x128xf32, #tpu.memory_space<vmem>>, %arg5: memref<1x128xf32, #tpu.memory_space<vmem>>, %arg6: memref<128x128xf32, #tpu.memory_space<vmem>>, %arg7: memref<1x128xf32, #tpu.memory_space<vmem>>, %arg8: memref<16x128xf32, #tpu.memory_space<vmem>>, %arg9: memref<16x128xf32, #tpu.memory_space<vmem>>) attributes {dimension_semantics = [#tpu.dimension_semantics<parallel>, #tpu.dimension_semantics<arbitrary>], iteration_bounds = array<i64: 1, 1>, scalar_prefetch = 0 : i64, scratch_operands = 1 : i64, tpu.core_type = #tpu.core_type<tc>, window_params = [{transform_indices = @transform_0, window_bounds = array<i64: 16, 128>}, {transform_indices = @transform_1, window_bounds = array<i64: 16, 128>}, {pipeline_mode = #tpu.pipeline_mode<synchronous>, transform_indices = @transform_2, window_bounds = array<i64: 128, 128>}, {pipeline_mode = #tpu.pipeline_mode<synchronous>, transform_indices = @transform_3, window_bounds = array<i64: 1, 128>}, {pipeline_mode = #tpu.pipeline_mode<synchronous>, transform_indices = @transform_4, window_bounds = array<i64: 128, 128>}, {pipeline_mode = #tpu.pipeline_mode<synchronous>, transform_indices = @transform_5, window_bounds = array<i64: 1, 128>}, {transform_indices = @transform_6, window_bounds = array<i64: 16, 128>}]} {
    %c0_i32 = arith.constant 0 : i32
    %0 = arith.cmpi eq, %arg1, %c0_i32 : i32
    %1 = arith.extui %0 : i1 to i32
    %c0_i32_0 = arith.constant 0 : i32
    %2 = arith.cmpi ne, %1, %c0_i32_0 : i32
    scf.if %2 {
      %c0_16 = arith.constant 0 : index
      %c0_17 = arith.constant 0 : index
      %19 = vector.load %arg7[%c0_16, %c0_17] : memref<1x128xf32, #tpu.memory_space<vmem>>, vector<1x128xf32>
      %20 = vector.shape_cast %19 : vector<1x128xf32> to vector<1x128xf32>
      %21 = vector.broadcast %20 : vector<1x128xf32> to vector<16x128xf32>
      %c0_18 = arith.constant 0 : index
      %c0_19 = arith.constant 0 : index
      %22 = vector.load %arg9[%c0_18, %c0_19] : memref<16x128xf32, #tpu.memory_space<vmem>>, vector<16x128xf32>
      tpu.vector_store %arg9[%c0_18, %c0_19], %21 {strides = array<i32>} : memref<16x128xf32, #tpu.memory_space<vmem>>, vector<16x128xf32>,
    } else {
    }
    %c0 = arith.constant 0 : index
    %c0_1 = arith.constant 0 : index
    %3 = vector.load %arg2[%c0, %c0_1] : memref<16x128xf32, #tpu.memory_space<vmem>>, vector<16x128xf32>
    %c0_2 = arith.constant 0 : index
    %c0_3 = arith.constant 0 : index
    %4 = vector.load %arg4[%c0_2, %c0_3] : memref<128x128xf32, #tpu.memory_space<vmem>>, vector<128x128xf32>
    %cst = arith.constant dense<0.000000e+00> : vector<16x128xf32>
    %5 = tpu.matmul %3, %4, %cst {dimension_numbers = #tpu.dot_dimension_numbers<[1], [0], [0], [1], [0, 0, 1, 1], [], []>} : vector<16x128xf32>, vector<128x128xf32>, vector<16x128xf32> -> vector<16x128xf32>
    %c0_4 = arith.constant 0 : index
    %c0_5 = arith.constant 0 : index
    %6 = vector.load %arg5[%c0_4, %c0_5] : memref<1x128xf32, #tpu.memory_space<vmem>>, vector<1x128xf32>
    %7 = vector.broadcast %6 : vector<1x128xf32> to vector<16x128xf32>
    %8 = arith.addf %5, %7 : vector<16x128xf32>
    %cst_6 = arith.constant 0.000000e+00 : f32
    %9 = vector.broadcast %cst_6 : f32 to vector<16x128xf32>
    %10 = arith.maximumf %8, %9 : vector<16x128xf32>
    %c0_7 = arith.constant 0 : index
    %c0_8 = arith.constant 0 : index
    %11 = vector.load %arg9[%c0_7, %c0_8] : memref<16x128xf32, #tpu.memory_space<vmem>>, vector<16x128xf32>
    %c0_9 = arith.constant 0 : index
    %c0_10 = arith.constant 0 : index
    %12 = vector.load %arg6[%c0_9, %c0_10] : memref<128x128xf32, #tpu.memory_space<vmem>>, vector<128x128xf32>
    %cst_11 = arith.constant dense<0.000000e+00> : vector<16x128xf32>
    %13 = tpu.matmul %10, %12, %cst_11 {dimension_numbers = #tpu.dot_dimension_numbers<[1], [0], [0], [1], [0, 0, 1, 1], [], []>} : vector<16x128xf32>, vector<128x128xf32>, vector<16x128xf32> -> vector<16x128xf32>
    %14 = arith.addf %11, %13 : vector<16x128xf32>
    %c0_12 = arith.constant 0 : index
    %c0_13 = arith.constant 0 : index
    %15 = vector.load %arg9[%c0_12, %c0_13] : memref<16x128xf32, #tpu.memory_space<vmem>>, vector<16x128xf32>
    tpu.vector_store %arg9[%c0_12, %c0_13], %14 {strides = array<i32>} : memref<16x128xf32, #tpu.memory_space<vmem>>, vector<16x128xf32>,
    %c0_i32_14 = arith.constant 0 : i32
    %16 = arith.cmpi eq, %arg1, %c0_i32_14 : i32
    %17 = arith.extui %16 : i1 to i32
    %c0_i32_15 = arith.constant 0 : i32
    %18 = arith.cmpi ne, %17, %c0_i32_15 : i32
    scf.if %18 {
      %c0_16 = arith.constant 0 : index
      %c0_17 = arith.constant 0 : index
      %19 = vector.load %arg9[%c0_16, %c0_17] : memref<16x128xf32, #tpu.memory_space<vmem>>, vector<16x128xf32>
      %c0_18 = arith.constant 0 : index
      %c0_19 = arith.constant 0 : index
      %20 = vector.load %arg3[%c0_18, %c0_19] : memref<16x128xf32, #tpu.memory_space<vmem>>, vector<16x128xf32>
      %21 = arith.addf %19, %20 : vector<16x128xf32>
      %cst_20 = arith.constant 0.000000e+00 : f32
      %22 = vector.broadcast %cst_20 : f32 to vector<16x128xf32>
      %23 = arith.maximumf %21, %22 : vector<16x128xf32>
      %c0_21 = arith.constant 0 : index
      %c0_22 = arith.constant 0 : index
      %24 = vector.load %arg8[%c0_21, %c0_22] : memref<16x128xf32, #tpu.memory_space<vmem>>, vector<16x128xf32>
      tpu.vector_store %arg8[%c0_21, %c0_22], %23 {strides = array<i32>} : memref<16x128xf32, #tpu.memory_space<vmem>>, vector<16x128xf32>,
    } else {
    }
    return
  }
  func.func @transform_0(%arg0: i32, %arg1: i32) -> (i32, i32) {
    %c0_i32 = arith.constant 0 : i32
    %c0_i32_0 = arith.constant 0 : i32
    return %arg0, %c0_i32 : i32, i32
  }
  func.func @transform_1(%arg0: i32, %arg1: i32) -> (i32, i32) {
    %c0_i32 = arith.constant 0 : i32
    %c0_i32_0 = arith.constant 0 : i32
    return %arg0, %c0_i32 : i32, i32
  }
  func.func @transform_2(%arg0: i32, %arg1: i32) -> (i32, i32) {
    %c0_i32 = arith.constant 0 : i32
    %c0_i32_0 = arith.constant 0 : i32
    return %c0_i32, %arg1 : i32, i32
  }
  func.func @transform_3(%arg0: i32, %arg1: i32) -> (i32, i32) {
    %c0_i32 = arith.constant 0 : i32
    %c0_i32_0 = arith.constant 0 : i32
    return %c0_i32, %arg1 : i32, i32
  }
  func.func @transform_4(%arg0: i32, %arg1: i32) -> (i32, i32) {
    %c0_i32 = arith.constant 0 : i32
    %c0_i32_0 = arith.constant 0 : i32
    return %arg1, %c0_i32 : i32, i32
  }
  func.func @transform_5(%arg0: i32, %arg1: i32) -> (i32, i32) {
    %c0_i32 = arith.constant 0 : i32
    %c0_i32_0 = arith.constant 0 : i32
    %c0_i32_1 = arith.constant 0 : i32
    return %c0_i32, %c0_i32_0 : i32, i32
  }
  func.func @transform_6(%arg0: i32, %arg1: i32) -> (i32, i32) {
    %c0_i32 = arith.constant 0 : i32
    %c0_i32_0 = arith.constant 0 : i32
    return %arg0, %c0_i32 : i32, i32
  }
}

module attributes {stable_mosaic.version = 11 : i64} {
  func.func @_propagator_res_kernel(%arg0: i32, %arg1: i32, %arg2: memref<16x128xf32, #tpu.memory_space<vmem>>, %arg3: memref<16x128xf32, #tpu.memory_space<vmem>>, %arg4: memref<128x128xf32, #tpu.memory_space<vmem>>, %arg5: memref<1x128xf32, #tpu.memory_space<vmem>>, %arg6: memref<128x128xf32, #tpu.memory_space<vmem>>, %arg7: memref<1x128xf32, #tpu.memory_space<vmem>>, %arg8: memref<16x128xf32, #tpu.memory_space<vmem>>, %arg9: memref<16x128xf32, #tpu.memory_space<vmem>>) attributes {dimension_semantics = [#tpu.dimension_semantics<parallel>, #tpu.dimension_semantics<arbitrary>], iteration_bounds = array<i64: 1, 1>, scalar_prefetch = 0 : i64, scratch_operands = 1 : i64, tpu.core_type = #tpu.core_type<tc>, window_params = [{transform_indices = @transform_0, window_bounds = array<i64: 16, 128>}, {transform_indices = @transform_1, window_bounds = array<i64: 16, 128>}, {transform_indices = @transform_2, window_bounds = array<i64: 128, 128>}, {transform_indices = @transform_3, window_bounds = array<i64: 1, 128>}, {transform_indices = @transform_4, window_bounds = array<i64: 128, 128>}, {pipeline_mode = #tpu.pipeline_mode<synchronous>, transform_indices = @transform_5, window_bounds = array<i64: 1, 128>}, {transform_indices = @transform_6, window_bounds = array<i64: 16, 128>}]} {
    %c0_i32 = arith.constant 0 : i32
    %0 = arith.cmpi eq, %arg1, %c0_i32 : i32
    %1 = arith.extui %0 : i1 to i32
    %c0_i32_0 = arith.constant 0 : i32
    %2 = arith.cmpi ne, %1, %c0_i32_0 : i32
    scf.if %2 {
      %c0_16 = arith.constant 0 : index
      %c0_17 = arith.constant 0 : index
      %19 = vector.load %arg7[%c0_16, %c0_17] : memref<1x128xf32, #tpu.memory_space<vmem>>, vector<1x128xf32>
      %20 = vector.shape_cast %19 : vector<1x128xf32> to vector<1x128xf32>
      %21 = vector.broadcast %20 : vector<1x128xf32> to vector<16x128xf32>
      %c0_18 = arith.constant 0 : index
      %c0_19 = arith.constant 0 : index
      %22 = vector.load %arg9[%c0_18, %c0_19] : memref<16x128xf32, #tpu.memory_space<vmem>>, vector<16x128xf32>
      tpu.vector_store %arg9[%c0_18, %c0_19], %21 {strides = array<i32>} : memref<16x128xf32, #tpu.memory_space<vmem>>, vector<16x128xf32>,
    } else {
    }
    %c0 = arith.constant 0 : index
    %c0_1 = arith.constant 0 : index
    %3 = vector.load %arg2[%c0, %c0_1] : memref<16x128xf32, #tpu.memory_space<vmem>>, vector<16x128xf32>
    %c0_2 = arith.constant 0 : index
    %c0_3 = arith.constant 0 : index
    %4 = vector.load %arg4[%c0_2, %c0_3] : memref<128x128xf32, #tpu.memory_space<vmem>>, vector<128x128xf32>
    %cst = arith.constant dense<0.000000e+00> : vector<16x128xf32>
    %5 = tpu.matmul %3, %4, %cst {dimension_numbers = #tpu.dot_dimension_numbers<[1], [0], [0], [1], [0, 0, 1, 1], [], []>} : vector<16x128xf32>, vector<128x128xf32>, vector<16x128xf32> -> vector<16x128xf32>
    %c0_4 = arith.constant 0 : index
    %c0_5 = arith.constant 0 : index
    %6 = vector.load %arg5[%c0_4, %c0_5] : memref<1x128xf32, #tpu.memory_space<vmem>>, vector<1x128xf32>
    %7 = vector.broadcast %6 : vector<1x128xf32> to vector<16x128xf32>
    %8 = arith.addf %5, %7 : vector<16x128xf32>
    %cst_6 = arith.constant 0.000000e+00 : f32
    %9 = vector.broadcast %cst_6 : f32 to vector<16x128xf32>
    %10 = arith.maximumf %8, %9 : vector<16x128xf32>
    %c0_7 = arith.constant 0 : index
    %c0_8 = arith.constant 0 : index
    %11 = vector.load %arg9[%c0_7, %c0_8] : memref<16x128xf32, #tpu.memory_space<vmem>>, vector<16x128xf32>
    %c0_9 = arith.constant 0 : index
    %c0_10 = arith.constant 0 : index
    %12 = vector.load %arg6[%c0_9, %c0_10] : memref<128x128xf32, #tpu.memory_space<vmem>>, vector<128x128xf32>
    %cst_11 = arith.constant dense<0.000000e+00> : vector<16x128xf32>
    %13 = tpu.matmul %10, %12, %cst_11 {dimension_numbers = #tpu.dot_dimension_numbers<[1], [0], [0], [1], [0, 0, 1, 1], [], []>} : vector<16x128xf32>, vector<128x128xf32>, vector<16x128xf32> -> vector<16x128xf32>
    %14 = arith.addf %11, %13 : vector<16x128xf32>
    %c0_12 = arith.constant 0 : index
    %c0_13 = arith.constant 0 : index
    %15 = vector.load %arg9[%c0_12, %c0_13] : memref<16x128xf32, #tpu.memory_space<vmem>>, vector<16x128xf32>
    tpu.vector_store %arg9[%c0_12, %c0_13], %14 {strides = array<i32>} : memref<16x128xf32, #tpu.memory_space<vmem>>, vector<16x128xf32>,
    %c0_i32_14 = arith.constant 0 : i32
    %16 = arith.cmpi eq, %arg1, %c0_i32_14 : i32
    %17 = arith.extui %16 : i1 to i32
    %c0_i32_15 = arith.constant 0 : i32
    %18 = arith.cmpi ne, %17, %c0_i32_15 : i32
    scf.if %18 {
      %c0_16 = arith.constant 0 : index
      %c0_17 = arith.constant 0 : index
      %19 = vector.load %arg9[%c0_16, %c0_17] : memref<16x128xf32, #tpu.memory_space<vmem>>, vector<16x128xf32>
      %c0_18 = arith.constant 0 : index
      %c0_19 = arith.constant 0 : index
      %20 = vector.load %arg3[%c0_18, %c0_19] : memref<16x128xf32, #tpu.memory_space<vmem>>, vector<16x128xf32>
      %21 = arith.addf %19, %20 : vector<16x128xf32>
      %cst_20 = arith.constant 0.000000e+00 : f32
      %22 = vector.broadcast %cst_20 : f32 to vector<16x128xf32>
      %23 = arith.maximumf %21, %22 : vector<16x128xf32>
      %c0_21 = arith.constant 0 : index
      %c0_22 = arith.constant 0 : index
      %24 = vector.load %arg8[%c0_21, %c0_22] : memref<16x128xf32, #tpu.memory_space<vmem>>, vector<16x128xf32>
      tpu.vector_store %arg8[%c0_21, %c0_22], %23 {strides = array<i32>} : memref<16x128xf32, #tpu.memory_space<vmem>>, vector<16x128xf32>,
    } else {
    }
    return
  }
  func.func @transform_0(%arg0: i32, %arg1: i32) -> (i32, i32) {
    %c0_i32 = arith.constant 0 : i32
    %c0_i32_0 = arith.constant 0 : i32
    return %arg0, %c0_i32 : i32, i32
  }
  func.func @transform_1(%arg0: i32, %arg1: i32) -> (i32, i32) {
    %c0_i32 = arith.constant 0 : i32
    %c0_i32_0 = arith.constant 0 : i32
    return %arg0, %c0_i32 : i32, i32
  }
  func.func @transform_2(%arg0: i32, %arg1: i32) -> (i32, i32) {
    %c0_i32 = arith.constant 0 : i32
    %c0_i32_0 = arith.constant 0 : i32
    return %c0_i32, %arg1 : i32, i32
  }
  func.func @transform_3(%arg0: i32, %arg1: i32) -> (i32, i32) {
    %c0_i32 = arith.constant 0 : i32
    %c0_i32_0 = arith.constant 0 : i32
    return %c0_i32, %arg1 : i32, i32
  }
  func.func @transform_4(%arg0: i32, %arg1: i32) -> (i32, i32) {
    %c0_i32 = arith.constant 0 : i32
    %c0_i32_0 = arith.constant 0 : i32
    return %arg1, %c0_i32 : i32, i32
  }
  func.func @transform_5(%arg0: i32, %arg1: i32) -> (i32, i32) {
    %c0_i32 = arith.constant 0 : i32
    %c0_i32_0 = arith.constant 0 : i32
    %c0_i32_1 = arith.constant 0 : i32
    return %c0_i32, %c0_i32_0 : i32, i32
  }
  func.func @transform_6(%arg0: i32, %arg1: i32) -> (i32, i32) {
    %c0_i32 = arith.constant 0 : i32
    %c0_i32_0 = arith.constant 0 : i32
    return %arg0, %c0_i32 : i32, i32
  }
}

</mosaic_0001>

<bundles_post_ra>
// kernel: tpu_custom_call.1
= control target key start
LH: loop header
LB: loop body
LE: loop exit
PB: predicated region body
PF: predicated region fallthrough
CT: control target
= control target key end

     0   :  { %11 = vsyncpa [#allocation4], 0  ;;  %s624_s0 = inlined_call_operand.hbm [shape: f32[16,128], index: 0, kind: input, shape index: {}]   ;;  %s625_s1 = inlined_call_operand.hbm [shape: f32[16,128], index: 1, kind: input, shape index: {}]   ;;  %s626_s2 = inlined_call_operand.hbm [shape: f32[128,128], index: 2, kind: input, shape index: {}]   ;;  %s627_s3 = inlined_call_operand.vmem [shape: f32[1,128], index: 3, kind: input, shape index: {}]   ;;  %s628_s4 = inlined_call_operand.hbm [shape: f32[128,128], index: 4, kind: input, shape index: {}]   ;;  %s629_s5 = inlined_call_operand.vmem [shape: f32[1,128], index: 5, kind: input, shape index: {}]   ;;  %s630_s6 = inlined_call_operand.hbm [shape: f32[16,128], index: 6, kind: output, shape index: {}]  }
   0x1   :  { %12 = vsyncpa [#allocation7], 0 }
   0x2   :  { %13 = vsyncpa [#allocation10], 0 }
   0x3   :  { %14 = vsyncpa [#allocation5], 0  ;;  %s546_s21 = smov [#allocation6]   ;;  %s547_s23 = smov [#allocation3]  }
   0x4   :  { %s32_s22 = sshll.u32 %s546_s21, 4  ;;  %s20_s24 = sshll.u32 %s547_s23, 4  ;;  %s33_s22 = int_to_ptr.vmem [resolvable:$true] %s32_s22  ;;  %s21_s24 = int_to_ptr.vmem [resolvable:$true] %s20_s24 }
   0x5   :  { %s446_s25 = scalar_lea.vmem %s33_s22, 256  ;;  %p451_p1 = scmp.lt.s32.totalorder %s33_s22, %s33_s22 }
   0x6   :  { %p447_p0 = scmp.ne.s32.totalorder %s33_s22, %s446_s25  ;;  %p452_p2 = scmp.lt.s32.totalorder %s446_s25, %s446_s25 }
   0x8   :  { %p453_p3 = por %p452_p2, %p451_p1 }
   0xa   :  { %p454_p4 = pnand %p453_p3, %p447_p0 }
   0xc   :  { %457 = shalt.err (!%p454_p4)
}
   0xd   :  { %s548_s26 = smov 128   ;;  %s549_s27 = smov 8  }
   0xe   :  { %38 = dma.hbm_to_vmem [thread:$0]  %s625_s1, 256, %s33_s22, [#allocation7], %s548_s26, %s548_s26, %s549_s27  }
   0xf   :  { %s466_s30 = scalar_lea.vmem %s21_s24, 256  ;;  %p471_p6 = scmp.lt.s32.totalorder %s21_s24, %s21_s24 }
  0x10   :  { %p467_p5 = scmp.ne.s32.totalorder %s21_s24, %s466_s30  ;;  %p472_p7 = scmp.lt.s32.totalorder %s466_s30, %s466_s30 }
  0x12   :  { %p473_p8 = por %p472_p7, %p471_p6 }
  0x14   :  { %p474_p9 = pnand %p473_p8, %p467_p5 }
  0x16   :  { %477 = shalt.err (!%p474_p9)
}
  0x17   :  { %26 = dma.hbm_to_vmem [thread:$0]  %s624_s0, 256, %s21_s24, [#allocation4], %s548_s26, %s548_s26, %s549_s27  }
  0x18   :  { %s550_s9 = smov [#allocation8]   ;;  %s551_s11 = smov [#allocation9]  }
  0x19   :  { %s44_s10 = sshll.u32 %s550_s9, 4  ;;  %s58_s12 = sshll.u32 %s551_s11, 4  ;;  %s45_s10 = int_to_ptr.vmem [resolvable:$true] %s44_s10  ;;  %s59_s12 = int_to_ptr.vmem [resolvable:$true] %s58_s12 }
  0x1a   :  { %s486_s1 = scalar_lea.vmem %s45_s10, 2048  ;;  %p491_p11 = scmp.lt.s32.totalorder %s45_s10, %s45_s10 }
  0x1b   :  { %p487_p10 = scmp.ne.s32.totalorder %s45_s10, %s486_s1  ;;  %p492_p12 = scmp.lt.s32.totalorder %s486_s1, %s486_s1 }
  0x1d   :  { %p493_p13 = por %p492_p12, %p491_p11 }
  0x1f   :  { %p494_p0 = pnand %p493_p13, %p487_p10 }
  0x21   :  { %497 = shalt.err (!%p494_p0)
}
  0x22   :  { %50 = dma.hbm_to_vmem [thread:$0]  %s626_s2, 2048, %s45_s10, [#allocation7], %s548_s26, %s548_s26, %s549_s27  }
  0x23   :  { %s506_s0 = scalar_lea.vmem %s59_s12, 2048  ;;  %p511_p2 = scmp.lt.s32.totalorder %s59_s12, %s59_s12 }
  0x24   :  { %p507_p1 = scmp.ne.s32.totalorder %s59_s12, %s506_s0  ;;  %p512_p3 = scmp.lt.s32.totalorder %s506_s0, %s506_s0 }
  0x26   :  { %p513_p4 = por %p512_p3, %p511_p2 }
  0x28   :  { %p514_p5 = pnand %p513_p4, %p507_p1 }
  0x2a   :  { %517 = shalt.err (!%p514_p5)
}
  0x2b   :  { %64 = dma.hbm_to_vmem [thread:$0]  %s628_s4, 2048, %s59_s12, [#allocation10], %s548_s26, %s548_s26, %s549_s27  }
  0x2c   :  { %538 = dma.done.wait [#allocation4], 256  }
  0x2d   :  { %539 = vsyncadd [#allocation4], 4294967040 }
  0x2e   :  { %540 = dma.done.wait [#allocation7], 2304  }
  0x2f   :  { %541 = vsyncadd [#allocation7], 4294964992 }
  0x30   :  { %542 = dma.done.wait [#allocation10], 2048  }
  0x31   :  { %543 = vsyncadd [#allocation10], 4294965248  ;;  %v109_v0 = vld [vmem:[#allocation8 + $0x78] sm:$0xff]  ;;  %v108_v1 = vld [vmem:[#allocation8 + $0x70] sm:$0xff] }
  0x32   :  { %361 = vmatprep.subr.mxu0 %v109_v0  ;;  %v107_v2 = vld [vmem:[#allocation8 + $0x68] sm:$0xff]  ;;  %v106_v3 = vld [vmem:[#allocation8 + $0x60] sm:$0xff]  ;;  %v105_v5 = vld [vmem:[#allocation8 + $0x58] sm:$0xff] }
  0x33   :  { %362 = vmatpush3.msra.mxu0 %v109_v0  ;;  %v92_v4 = vld [vmem:[#allocation3] sm:$0xff]  ;;  %v211_v6 = vld [vmem:[#allocation9 + $0x78] sm:$0xff]  ;;  %v210_v7 = vld [vmem:[#allocation9 + $0x70] sm:$0xff] }
  0x34   :  { %363 = vmatprep.subr.mxu0 %v108_v1  ;;  %393 = vmatprep.mubr.f32.mxu0 %v92_v4  ;;  %v104_v8 = vld [vmem:[#allocation8 + $0x50] sm:$0xff]  ;;  %v209_v9 = vld [vmem:[#allocation9 + $0x68] sm:$0xff]  ;;  %v208_v11 = vld [vmem:[#allocation9 + $0x60] sm:$0xff] }
  0x35   :  { %364 = vmatpush3.msra.mxu0 %v108_v1  ;;  %396 = vmatprep.subr.mxu1 %v211_v6  ;;  %v103_v10 = vld [vmem:[#allocation8 + $0x48] sm:$0xff]  ;;  %v102_v12 = vld [vmem:[#allocation8 + $0x40] sm:$0xff]  ;;  %v207_v13 = vld [vmem:[#allocation9 + $0x58] sm:$0xff] }
  0x36   :  { %365 = vmatprep.subr.mxu0 %v107_v2  ;;  %397 = vmatpush3.msra.mxu1 %v211_v6  ;;  %v101_v14 = vld [vmem:[#allocation8 + $0x38] sm:$0xff]  ;;  %v206_v15 = vld [vmem:[#allocation9 + $0x50] sm:$0xff]  ;;  %v205_v17 = vld [vmem:[#allocation9 + $0x48] sm:$0xff] }
  0x37   :  { %366 = vmatpush3.msra.mxu0 %v107_v2  ;;  %398 = vmatprep.subr.mxu1 %v210_v7  ;;  %v100_v16 = vld [vmem:[#allocation8 + $0x30] sm:$0xff]  ;;  %v99_v18 = vld [vmem:[#allocation8 + $0x28] sm:$0xff]  ;;  %v204_v19 = vld [vmem:[#allocation9 + $0x40] sm:$0xff] }
  0x38   :  { %367 = vmatprep.subr.mxu0 %v106_v3  ;;  %399 = vmatpush3.msra.mxu1 %v210_v7  ;;  %v98_v20 = vld [vmem:[#allocation8 + $0x20] sm:$0xff]  ;;  %v203_v21 = vld [vmem:[#allocation9 + $0x38] sm:$0xff]  ;;  %v202_v23 = vld [vmem:[#allocation9 + $0x30] sm:$0xff] }
  0x39   :  { %368 = vmatpush3.msra.mxu0 %v106_v3  ;;  %400 = vmatprep.subr.mxu1 %v209_v9  ;;  %v97_v22 = vld [vmem:[#allocation8 + $0x18] sm:$0xff]  ;;  %v96_v24 = vld [vmem:[#allocation8 + $0x10] sm:$0xff]  ;;  %v201_v25 = vld [vmem:[#allocation9 + $0x28] sm:$0xff] }
  0x3a   :  { %369 = vmatprep.subr.mxu0 %v105_v5  ;;  %401 = vmatpush3.msra.mxu1 %v209_v9  ;;  %v95_v26 = vld [vmem:[#allocation8 + $0x8] sm:$0xff]  ;;  %v200_v27 = vld [vmem:[#allocation9 + $0x20] sm:$0xff]  ;;  %v199_v30 = vld [vmem:[#allocation9 + $0x18] sm:$0xff] }
  0x3b   :  { %370 = vmatpush3.msra.mxu0 %v105_v5  ;;  %402 = vmatprep.subr.mxu1 %v208_v11  ;;  %v94_v28 = vld [vmem:[#allocation8] sm:$0xff]  ;;  %v93_v29 = vld [vmem:[#allocation3 + $0x8] sm:$0xff]  ;;  %v198_v31 = vld [vmem:[#allocation9 + $0x10] sm:$0xff] }
  0x3c   :  { %371 = vmatprep.subr.mxu0 %v104_v8  ;;  %403 = vmatpush3.msra.mxu1 %v208_v11  ;;  %v197_v32 = vld [vmem:[#allocation9 + $0x8] sm:$0xff]  ;;  %v196_v33 = vld [vmem:[#allocation9] sm:$0xff]  ;;  %v297_v43 = vld [vmem:[#allocation6 + $0x8] sm:$0xff] }
  0x3d   :  { %372 = vmatpush3.msra.mxu0 %v104_v8  ;;  %404 = vmatprep.subr.mxu1 %v207_v13  ;;  %v324_v34 = vld [vmem:[%s627_s3] ss:$0 sm:$0xff]  ;;  %v296_v46 = vld [vmem:[#allocation6] sm:$0xff]  ;;  %s552_s3 = smov [#allocation11]  }
  0x3e   :  { %373 = vmatprep.subr.mxu0 %v103_v10  ;;  %405 = vmatpush3.msra.mxu1 %v207_v13  ;;  %v323_v41 = vld [vmem:[%s629_s5] ss:$0 sm:$0xff]  ;;  %s309_s19 = sshll.u32 %s552_s3, 4  ;;  %s310_s19 = int_to_ptr.vmem [resolvable:$true] %s309_s19 }
  0x3f   :  { %374 = vmatpush3.msra.mxu0 %v103_v10  ;;  %406 = vmatprep.subr.mxu1 %v206_v15  ;;  %s518_s20 = scalar_lea.vmem %s310_s19, 256  ;;  %p523_p7 = scmp.lt.s32.totalorder %s310_s19, %s310_s19 }
  0x40   :  { %375 = vmatprep.subr.mxu0 %v102_v12  ;;  %407 = vmatpush3.msra.mxu1 %v206_v15  ;;  %p519_p6 = scmp.ne.s32.totalorder %s310_s19, %s518_s20  ;;  %p524_p8 = scmp.lt.s32.totalorder %s518_s20, %s518_s20 }
  0x41   :  { %376 = vmatpush3.msra.mxu0 %v102_v12  ;;  %408 = vmatprep.subr.mxu1 %v205_v17 }
  0x42   :  { %377 = vmatprep.subr.mxu0 %v101_v14  ;;  %409 = vmatpush3.msra.mxu1 %v205_v17  ;;  %p525_p9 = por %p524_p8, %p523_p7 }
  0x43   :  { %378 = vmatpush3.msra.mxu0 %v101_v14  ;;  %410 = vmatprep.subr.mxu1 %v204_v19 }
  0x44   :  { %379 = vmatprep.subr.mxu0 %v100_v16  ;;  %411 = vmatpush3.msra.mxu1 %v204_v19  ;;  %p526_p10 = pnand %p525_p9, %p519_p6 }
  0x45   :  { %380 = vmatpush3.msra.mxu0 %v100_v16  ;;  %412 = vmatprep.subr.mxu1 %v203_v21 }
  0x46   :  { %381 = vmatprep.subr.mxu0 %v99_v18  ;;  %413 = vmatpush3.msra.mxu1 %v203_v21 }
  0x47   :  { %382 = vmatpush3.msra.mxu0 %v99_v18  ;;  %414 = vmatprep.subr.mxu1 %v202_v23 }
  0x48   :  { %383 = vmatprep.subr.mxu0 %v98_v20  ;;  %415 = vmatpush3.msra.mxu1 %v202_v23 }
  0x49   :  { %384 = vmatpush3.msra.mxu0 %v98_v20  ;;  %416 = vmatprep.subr.mxu1 %v201_v25 }
  0x4a   :  { %385 = vmatprep.subr.mxu0 %v97_v22  ;;  %417 = vmatpush3.msra.mxu1 %v201_v25 }
  0x4b   :  { %386 = vmatpush3.msra.mxu0 %v97_v22  ;;  %418 = vmatprep.subr.mxu1 %v200_v27 }
  0x4c   :  { %387 = vmatprep.subr.mxu0 %v96_v24  ;;  %419 = vmatpush3.msra.mxu1 %v200_v27 }
  0x4d   :  { %388 = vmatpush3.msra.mxu0 %v96_v24  ;;  %420 = vmatprep.subr.mxu1 %v199_v30 }
  0x4e   :  { %389 = vmatprep.subr.mxu0 %v95_v26  ;;  %421 = vmatpush3.msra.mxu1 %v199_v30 }
  0x4f   :  { %390 = vmatpush3.msra.mxu0 %v95_v26  ;;  %422 = vmatprep.subr.mxu1 %v198_v31 }
  0x50   :  { %391 = vmatprep.subr.mxu0 %v94_v28  ;;  %423 = vmatpush3.msra.mxu1 %v198_v31 }
  0x51   :  { %392 = vmatpush3.msra.mxu0 %v94_v28  ;;  %424 = vmatprep.subr.mxu1 %v197_v32 }
  0x52   :  { %394 = vmatmul.mubr.f32.vlgmr.msra.gmra.mxu0 %v93_v29  ;;  %425 = vmatpush3.msra.mxu1 %v197_v32 }
  0x53   :  { %426 = vmatprep.subr.mxu1 %v196_v33 }
  0x54   :  { %427 = vmatpush3.msra.mxu1 %v196_v33 }
 0x112   :  { %v395_v35 = vpop.f32.mrf.mxu0 }
 0x113   :  { %v189_v36 = vadd.f32 %v395_v35, %v324_v34 }
 0x114   :  { %v183_v37 = vpop.f32.mrf.mxu0 }
 0x115   :  { %v184_v38 = vadd.f32 %v324_v34, %v183_v37  ;;  %v193_v40 = vmax.f32 %v189_v36, 0.0 }
 0x117   :  { %v192_v39 = vmax.f32 %v184_v38, 0.0 }
 0x119   :  { %428 = vmatprep.mubr.f32.mxu1 %v192_v39 }
 0x11a   :  { %429 = vmatmul.mubr.f32.vlgmr.msra.gmra.mxu1 %v193_v40 }
 0x1da   :  { %v430_v42 = vpop.f32.mrf.mxu1 }
 0x1db   :  { %v288_v44 = vadd.f32 %v430_v42, %v323_v41 }
 0x1dc   :  { %v278_v45 = vpop.f32.mrf.mxu1 }
 0x1dd   :  { %v299_v47 = vadd.f32 %v297_v43, %v288_v44  ;;  %v287_v48 = vadd.f32 %v323_v41, %v278_v45 }
 0x1df   :  { %v301_v49 = vmax.f32 %v299_v47, 0.0  ;;  %v298_v50 = vadd.f32 %v296_v46, %v287_v48 }
 0x1e1   :  { %303 = vst [vmem:[#allocation11 + $0x8] sm:$0xff] %v301_v49  ;;  %v300_v51 = vmax.f32 %v298_v50, 0.0 }
 0x1e3   :  { %302 = vst [vmem:[#allocation11] sm:$0xff] %v300_v51 }
 0x1e4   :  { %529 = shalt.err (!%p526_p10)
}
 0x1e5   :  { %315 = dma.vmem_to_hbm [thread:$0]  %s310_s19, 256, %s630_s6, [#allocation5], %s548_s26, %s548_s26, %s549_s27  }
 0x1e6   :  { %544 = dma.done.wait [#allocation5], 256  }
 0x1e7   :  { %545 = vsyncadd [#allocation5], 4294967040 }
 0x1e8   :  { %319 = vsyncpa [#allocation4], 1 }
 0x1e9   :  { %320 = vsyncpa [#allocation7], 1 }
 0x1ea   :  { %321 = vsyncpa [#allocation10], 1 }
 0x1eb   :  { %322 = vsyncpa [#allocation5], 1 }

// kernel: tpu_custom_call.1
= control target key start
LH: loop header
LB: loop body
LE: loop exit
PB: predicated region body
PF: predicated region fallthrough
CT: control target
= control target key end

     0   :  { %11 = vsyncpa [#allocation4], 0  ;;  %s624_s0 = inlined_call_operand.hbm [shape: f32[16,128], index: 0, kind: input, shape index: {}]   ;;  %s625_s1 = inlined_call_operand.hbm [shape: f32[16,128], index: 1, kind: input, shape index: {}]   ;;  %s626_s2 = inlined_call_operand.hbm [shape: f32[128,128], index: 2, kind: input, shape index: {}]   ;;  %s627_s3 = inlined_call_operand.vmem [shape: f32[1,128], index: 3, kind: input, shape index: {}]   ;;  %s628_s4 = inlined_call_operand.hbm [shape: f32[128,128], index: 4, kind: input, shape index: {}]   ;;  %s629_s5 = inlined_call_operand.vmem [shape: f32[1,128], index: 5, kind: input, shape index: {}]   ;;  %s630_s6 = inlined_call_operand.hbm [shape: f32[16,128], index: 6, kind: output, shape index: {}]  }
   0x1   :  { %12 = vsyncpa [#allocation7], 0 }
   0x2   :  { %13 = vsyncpa [#allocation10], 0 }
   0x3   :  { %14 = vsyncpa [#allocation5], 0  ;;  %s546_s21 = smov [#allocation6]   ;;  %s547_s23 = smov [#allocation3]  }
   0x4   :  { %s32_s22 = sshll.u32 %s546_s21, 4  ;;  %s20_s24 = sshll.u32 %s547_s23, 4  ;;  %s33_s22 = int_to_ptr.vmem [resolvable:$true] %s32_s22  ;;  %s21_s24 = int_to_ptr.vmem [resolvable:$true] %s20_s24 }
   0x5   :  { %s446_s25 = scalar_lea.vmem %s33_s22, 256  ;;  %p451_p1 = scmp.lt.s32.totalorder %s33_s22, %s33_s22 }
   0x6   :  { %p447_p0 = scmp.ne.s32.totalorder %s33_s22, %s446_s25  ;;  %p452_p2 = scmp.lt.s32.totalorder %s446_s25, %s446_s25 }
   0x8   :  { %p453_p3 = por %p452_p2, %p451_p1 }
   0xa   :  { %p454_p4 = pnand %p453_p3, %p447_p0 }
   0xc   :  { %457 = shalt.err (!%p454_p4)
}
   0xd   :  { %s548_s26 = smov 128   ;;  %s549_s27 = smov 8  }
   0xe   :  { %38 = dma.hbm_to_vmem [thread:$0]  %s625_s1, 256, %s33_s22, [#allocation7], %s548_s26, %s548_s26, %s549_s27  }
   0xf   :  { %s466_s30 = scalar_lea.vmem %s21_s24, 256  ;;  %p471_p6 = scmp.lt.s32.totalorder %s21_s24, %s21_s24 }
  0x10   :  { %p467_p5 = scmp.ne.s32.totalorder %s21_s24, %s466_s30  ;;  %p472_p7 = scmp.lt.s32.totalorder %s466_s30, %s466_s30 }
  0x12   :  { %p473_p8 = por %p472_p7, %p471_p6 }
  0x14   :  { %p474_p9 = pnand %p473_p8, %p467_p5 }
  0x16   :  { %477 = shalt.err (!%p474_p9)
}
  0x17   :  { %26 = dma.hbm_to_vmem [thread:$0]  %s624_s0, 256, %s21_s24, [#allocation4], %s548_s26, %s548_s26, %s549_s27  }
  0x18   :  { %s550_s9 = smov [#allocation8]   ;;  %s551_s11 = smov [#allocation9]  }
  0x19   :  { %s44_s10 = sshll.u32 %s550_s9, 4  ;;  %s58_s12 = sshll.u32 %s551_s11, 4  ;;  %s45_s10 = int_to_ptr.vmem [resolvable:$true] %s44_s10  ;;  %s59_s12 = int_to_ptr.vmem [resolvable:$true] %s58_s12 }
  0x1a   :  { %s486_s1 = scalar_lea.vmem %s45_s10, 2048  ;;  %p491_p11 = scmp.lt.s32.totalorder %s45_s10, %s45_s10 }
  0x1b   :  { %p487_p10 = scmp.ne.s32.totalorder %s45_s10, %s486_s1  ;;  %p492_p12 = scmp.lt.s32.totalorder %s486_s1, %s486_s1 }
  0x1d   :  { %p493_p13 = por %p492_p12, %p491_p11 }
  0x1f   :  { %p494_p0 = pnand %p493_p13, %p487_p10 }
  0x21   :  { %497 = shalt.err (!%p494_p0)
}
  0x22   :  { %50 = dma.hbm_to_vmem [thread:$0]  %s626_s2, 2048, %s45_s10, [#allocation7], %s548_s26, %s548_s26, %s549_s27  }
  0x23   :  { %s506_s0 = scalar_lea.vmem %s59_s12, 2048  ;;  %p511_p2 = scmp.lt.s32.totalorder %s59_s12, %s59_s12 }
  0x24   :  { %p507_p1 = scmp.ne.s32.totalorder %s59_s12, %s506_s0  ;;  %p512_p3 = scmp.lt.s32.totalorder %s506_s0, %s506_s0 }
  0x26   :  { %p513_p4 = por %p512_p3, %p511_p2 }
  0x28   :  { %p514_p5 = pnand %p513_p4, %p507_p1 }
  0x2a   :  { %517 = shalt.err (!%p514_p5)
}
  0x2b   :  { %64 = dma.hbm_to_vmem [thread:$0]  %s628_s4, 2048, %s59_s12, [#allocation10], %s548_s26, %s548_s26, %s549_s27  }
  0x2c   :  { %538 = dma.done.wait [#allocation4], 256  }
  0x2d   :  { %539 = vsyncadd [#allocation4], 4294967040 }
  0x2e   :  { %540 = dma.done.wait [#allocation7], 2304  }
  0x2f   :  { %541 = vsyncadd [#allocation7], 4294964992 }
  0x30   :  { %542 = dma.done.wait [#allocation10], 2048  }
  0x31   :  { %543 = vsyncadd [#allocation10], 4294965248  ;;  %v109_v0 = vld [vmem:[#allocation8 + $0x78] sm:$0xff]  ;;  %v108_v1 = vld [vmem:[#allocation8 + $0x70] sm:$0xff] }
  0x32   :  { %361 = vmatprep.subr.mxu0 %v109_v0  ;;  %v107_v2 = vld [vmem:[#allocation8 + $0x68] sm:$0xff]  ;;  %v106_v3 = vld [vmem:[#allocation8 + $0x60] sm:$0xff]  ;;  %v105_v5 = vld [vmem:[#allocation8 + $0x58] sm:$0xff] }
  0x33   :  { %362 = vmatpush3.msra.mxu0 %v109_v0  ;;  %v92_v4 = vld [vmem:[#allocation3] sm:$0xff]  ;;  %v211_v6 = vld [vmem:[#allocation9 + $0x78] sm:$0xff]  ;;  %v210_v7 = vld [vmem:[#allocation9 + $0x70] sm:$0xff] }
  0x34   :  { %363 = vmatprep.subr.mxu0 %v108_v1  ;;  %393 = vmatprep.mubr.f32.mxu0 %v92_v4  ;;  %v104_v8 = vld [vmem:[#allocation8 + $0x50] sm:$0xff]  ;;  %v209_v9 = vld [vmem:[#allocation9 + $0x68] sm:$0xff]  ;;  %v208_v11 = vld [vmem:[#allocation9 + $0x60] sm:$0xff] }
  0x35   :  { %364 = vmatpush3.msra.mxu0 %v108_v1  ;;  %396 = vmatprep.subr.mxu1 %v211_v6  ;;  %v103_v10 = vld [vmem:[#allocation8 + $0x48] sm:$0xff]  ;;  %v102_v12 = vld [vmem:[#allocation8 + $0x40] sm:$0xff]  ;;  %v207_v13 = vld [vmem:[#allocation9 + $0x58] sm:$0xff] }
  0x36   :  { %365 = vmatprep.subr.mxu0 %v107_v2  ;;  %397 = vmatpush3.msra.mxu1 %v211_v6  ;;  %v101_v14 = vld [vmem:[#allocation8 + $0x38] sm:$0xff]  ;;  %v206_v15 = vld [vmem:[#allocation9 + $0x50] sm:$0xff]  ;;  %v205_v17 = vld [vmem:[#allocation9 + $0x48] sm:$0xff] }
  0x37   :  { %366 = vmatpush3.msra.mxu0 %v107_v2  ;;  %398 = vmatprep.subr.mxu1 %v210_v7  ;;  %v100_v16 = vld [vmem:[#allocation8 + $0x30] sm:$0xff]  ;;  %v99_v18 = vld [vmem:[#allocation8 + $0x28] sm:$0xff]  ;;  %v204_v19 = vld [vmem:[#allocation9 + $0x40] sm:$0xff] }
  0x38   :  { %367 = vmatprep.subr.mxu0 %v106_v3  ;;  %399 = vmatpush3.msra.mxu1 %v210_v7  ;;  %v98_v20 = vld [vmem:[#allocation8 + $0x20] sm:$0xff]  ;;  %v203_v21 = vld [vmem:[#allocation9 + $0x38] sm:$0xff]  ;;  %v202_v23 = vld [vmem:[#allocation9 + $0x30] sm:$0xff] }
  0x39   :  { %368 = vmatpush3.msra.mxu0 %v106_v3  ;;  %400 = vmatprep.subr.mxu1 %v209_v9  ;;  %v97_v22 = vld [vmem:[#allocation8 + $0x18] sm:$0xff]  ;;  %v96_v24 = vld [vmem:[#allocation8 + $0x10] sm:$0xff]  ;;  %v201_v25 = vld [vmem:[#allocation9 + $0x28] sm:$0xff] }
  0x3a   :  { %369 = vmatprep.subr.mxu0 %v105_v5  ;;  %401 = vmatpush3.msra.mxu1 %v209_v9  ;;  %v95_v26 = vld [vmem:[#allocation8 + $0x8] sm:$0xff]  ;;  %v200_v27 = vld [vmem:[#allocation9 + $0x20] sm:$0xff]  ;;  %v199_v30 = vld [vmem:[#allocation9 + $0x18] sm:$0xff] }
  0x3b   :  { %370 = vmatpush3.msra.mxu0 %v105_v5  ;;  %402 = vmatprep.subr.mxu1 %v208_v11  ;;  %v94_v28 = vld [vmem:[#allocation8] sm:$0xff]  ;;  %v93_v29 = vld [vmem:[#allocation3 + $0x8] sm:$0xff]  ;;  %v198_v31 = vld [vmem:[#allocation9 + $0x10] sm:$0xff] }
  0x3c   :  { %371 = vmatprep.subr.mxu0 %v104_v8  ;;  %403 = vmatpush3.msra.mxu1 %v208_v11  ;;  %v197_v32 = vld [vmem:[#allocation9 + $0x8] sm:$0xff]  ;;  %v196_v33 = vld [vmem:[#allocation9] sm:$0xff]  ;;  %v297_v43 = vld [vmem:[#allocation6 + $0x8] sm:$0xff] }
  0x3d   :  { %372 = vmatpush3.msra.mxu0 %v104_v8  ;;  %404 = vmatprep.subr.mxu1 %v207_v13  ;;  %v324_v34 = vld [vmem:[%s627_s3] ss:$0 sm:$0xff]  ;;  %v296_v46 = vld [vmem:[#allocation6] sm:$0xff]  ;;  %s552_s3 = smov [#allocation11]  }
  0x3e   :  { %373 = vmatprep.subr.mxu0 %v103_v10  ;;  %405 = vmatpush3.msra.mxu1 %v207_v13  ;;  %v323_v41 = vld [vmem:[%s629_s5] ss:$0 sm:$0xff]  ;;  %s309_s19 = sshll.u32 %s552_s3, 4  ;;  %s310_s19 = int_to_ptr.vmem [resolvable:$true] %s309_s19 }
  0x3f   :  { %374 = vmatpush3.msra.mxu0 %v103_v10  ;;  %406 = vmatprep.subr.mxu1 %v206_v15  ;;  %s518_s20 = scalar_lea.vmem %s310_s19, 256  ;;  %p523_p7 = scmp.lt.s32.totalorder %s310_s19, %s310_s19 }
  0x40   :  { %375 = vmatprep.subr.mxu0 %v102_v12  ;;  %407 = vmatpush3.msra.mxu1 %v206_v15  ;;  %p519_p6 = scmp.ne.s32.totalorder %s310_s19, %s518_s20  ;;  %p524_p8 = scmp.lt.s32.totalorder %s518_s20, %s518_s20 }
  0x41   :  { %376 = vmatpush3.msra.mxu0 %v102_v12  ;;  %408 = vmatprep.subr.mxu1 %v205_v17 }
  0x42   :  { %377 = vmatprep.subr.mxu0 %v101_v14  ;;  %409 = vmatpush3.msra.mxu1 %v205_v17  ;;  %p525_p9 = por %p524_p8, %p523_p7 }
  0x43   :  { %378 = vmatpush3.msra.mxu0 %v101_v14  ;;  %410 = vmatprep.subr.mxu1 %v204_v19 }
  0x44   :  { %379 = vmatprep.subr.mxu0 %v100_v16  ;;  %411 = vmatpush3.msra.mxu1 %v204_v19  ;;  %p526_p10 = pnand %p525_p9, %p519_p6 }
  0x45   :  { %380 = vmatpush3.msra.mxu0 %v100_v16  ;;  %412 = vmatprep.subr.mxu1 %v203_v21 }
  0x46   :  { %381 = vmatprep.subr.mxu0 %v99_v18  ;;  %413 = vmatpush3.msra.mxu1 %v203_v21 }
  0x47   :  { %382 = vmatpush3.msra.mxu0 %v99_v18  ;;  %414 = vmatprep.subr.mxu1 %v202_v23 }
  0x48   :  { %383 = vmatprep.subr.mxu0 %v98_v20  ;;  %415 = vmatpush3.msra.mxu1 %v202_v23 }
  0x49   :  { %384 = vmatpush3.msra.mxu0 %v98_v20  ;;  %416 = vmatprep.subr.mxu1 %v201_v25 }
  0x4a   :  { %385 = vmatprep.subr.mxu0 %v97_v22  ;;  %417 = vmatpush3.msra.mxu1 %v201_v25 }
  0x4b   :  { %386 = vmatpush3.msra.mxu0 %v97_v22  ;;  %418 = vmatprep.subr.mxu1 %v200_v27 }
  0x4c   :  { %387 = vmatprep.subr.mxu0 %v96_v24  ;;  %419 = vmatpush3.msra.mxu1 %v200_v27 }
  0x4d   :  { %388 = vmatpush3.msra.mxu0 %v96_v24  ;;  %420 = vmatprep.subr.mxu1 %v199_v30 }
  0x4e   :  { %389 = vmatprep.subr.mxu0 %v95_v26  ;;  %421 = vmatpush3.msra.mxu1 %v199_v30 }
  0x4f   :  { %390 = vmatpush3.msra.mxu0 %v95_v26  ;;  %422 = vmatprep.subr.mxu1 %v198_v31 }
  0x50   :  { %391 = vmatprep.subr.mxu0 %v94_v28  ;;  %423 = vmatpush3.msra.mxu1 %v198_v31 }
  0x51   :  { %392 = vmatpush3.msra.mxu0 %v94_v28  ;;  %424 = vmatprep.subr.mxu1 %v197_v32 }
  0x52   :  { %394 = vmatmul.mubr.f32.vlgmr.msra.gmra.mxu0 %v93_v29  ;;  %425 = vmatpush3.msra.mxu1 %v197_v32 }
  0x53   :  { %426 = vmatprep.subr.mxu1 %v196_v33 }
  0x54   :  { %427 = vmatpush3.msra.mxu1 %v196_v33 }
 0x112   :  { %v395_v35 = vpop.f32.mrf.mxu0 }
 0x113   :  { %v189_v36 = vadd.f32 %v395_v35, %v324_v34 }
 0x114   :  { %v183_v37 = vpop.f32.mrf.mxu0 }
 0x115   :  { %v184_v38 = vadd.f32 %v324_v34, %v183_v37  ;;  %v193_v40 = vmax.f32 %v189_v36, 0.0 }
 0x117   :  { %v192_v39 = vmax.f32 %v184_v38, 0.0 }
 0x119   :  { %428 = vmatprep.mubr.f32.mxu1 %v192_v39 }
 0x11a   :  { %429 = vmatmul.mubr.f32.vlgmr.msra.gmra.mxu1 %v193_v40 }
 0x1da   :  { %v430_v42 = vpop.f32.mrf.mxu1 }
 0x1db   :  { %v288_v44 = vadd.f32 %v430_v42, %v323_v41 }
 0x1dc   :  { %v278_v45 = vpop.f32.mrf.mxu1 }
 0x1dd   :  { %v299_v47 = vadd.f32 %v297_v43, %v288_v44  ;;  %v287_v48 = vadd.f32 %v323_v41, %v278_v45 }
 0x1df   :  { %v301_v49 = vmax.f32 %v299_v47, 0.0  ;;  %v298_v50 = vadd.f32 %v296_v46, %v287_v48 }
 0x1e1   :  { %303 = vst [vmem:[#allocation11 + $0x8] sm:$0xff] %v301_v49  ;;  %v300_v51 = vmax.f32 %v298_v50, 0.0 }
 0x1e3   :  { %302 = vst [vmem:[#allocation11] sm:$0xff] %v300_v51 }
 0x1e4   :  { %529 = shalt.err (!%p526_p10)
}
 0x1e5   :  { %315 = dma.vmem_to_hbm [thread:$0]  %s310_s19, 256, %s630_s6, [#allocation5], %s548_s26, %s548_s26, %s549_s27  }
 0x1e6   :  { %544 = dma.done.wait [#allocation5], 256  }
 0x1e7   :  { %545 = vsyncadd [#allocation5], 4294967040 }
 0x1e8   :  { %319 = vsyncpa [#allocation4], 1 }
 0x1e9   :  { %320 = vsyncpa [#allocation7], 1 }
 0x1ea   :  { %321 = vsyncpa [#allocation10], 1 }
 0x1eb   :  { %322 = vsyncpa [#allocation5], 1 }

</bundles_post_ra>
